<compile_context>
chip_gen: v7x
topology: tpu7x:2x2x1
jax: 0.10.0
libtpu: 0.0.40
codegen_flags: <defaults>
</compile_context>

<pallas_src>
import jax
import jax.numpy as jnp
from jax.experimental import pallas as pl
from jax.experimental.pallas import tpu as pltpu

_LANES = 128
_SUBLANES = 8
_MAX_TILE_ROWS = 2048        # 1 MiB f32 / 512 KiB bf16 per input block
_SMALL_N_FAST_PATH = 1 << 16  # below this, plain jnp beats launch+DMA overhead


def _round_up(x, m):
    return ((x + m - 1) // m) * m


def _value_loss_jnp(pred, targ, need_corr):
    """Pure-jnp fallback / reference implementation."""
    p = jnp.asarray(pred, jnp.float32)
    t = jnp.asarray(targ, jnp.float32)
    d = p - t
    loss = jnp.mean(d * d)
    if need_corr:
        pf = p.reshape(-1)
        tf = t.reshape(-1)
        pc = pf - jnp.mean(pf)
        tc = tf - jnp.mean(tf)
        corr = jnp.sum(pc * tc) / jnp.sqrt(jnp.sum(pc * pc) * jnp.sum(tc * tc))
    else:
        corr = jnp.float32(jnp.nan)
    info = {
        'mean_pred': jnp.mean(p), 'mean_targ': jnp.mean(t),
        'min_pred': jnp.min(p), 'min_targ': jnp.min(t),
        'max_pred': jnp.max(p), 'max_targ': jnp.max(t),
        'corr': corr,
    }
    return loss, info


def _make_value_loss_kernel(n, tile_rows, grid, need_corr, needs_mask):
    k = tile_rows // _SUBLANES
    n_full_rows, n_rem = divmod(n, _LANES)

    def _reduce(x, op):
        # (tile_rows, 128) -> (8, 128) using only vreg-wise (VPU) ops.
        if k == 1:
            return x
        return op(x.reshape(k, _SUBLANES, _LANES), axis=0)

    def kernel(shift_ref, pred_ref, targ_ref, out_ref, *accs):
        if need_corr:
            (sse_acc, sp_acc, st_acc, spp_acc, stt_acc, spt_acc,
             minp_acc, mint_acc, maxp_acc, maxt_acc) = accs
        else:
            (sse_acc, sp_acc, st_acc,
             minp_acc, mint_acc, maxp_acc, maxt_acc) = accs
            spp_acc = stt_acc = spt_acc = None

        step = pl.program_id(0)
        last = pl.num_programs(0) - 1

        @pl.when(step == 0)
        def _init():
            zeros = jnp.zeros((_SUBLANES, _LANES), jnp.float32)
            pinf = jnp.full((_SUBLANES, _LANES), jnp.inf, jnp.float32)
            sse_acc[...] = zeros
            sp_acc[...] = zeros
            st_acc[...] = zeros
            if need_corr:
                spp_acc[...] = zeros
                stt_acc[...] = zeros
                spt_acc[...] = zeros
            minp_acc[...] = pinf
            mint_acc[...] = pinf
            maxp_acc[...] = -pinf
            maxt_acc[...] = -pinf

        # Shifts (first element of pred / targ) live in SMEM via scalar prefetch.
        shift_p = shift_ref[0]
        shift_t = shift_ref[1]

        def _accumulate(masked):
            p_raw = pred_ref[...].astype(jnp.float32)
            t_raw = targ_ref[...].astype(jnp.float32)
            d = p_raw - t_raw              # unshifted difference (exact)
            p = p_raw - shift_p            # shifted values for moment sums
            t = t_raw - shift_t
            if masked:
                # Only emitted (and only executed) for the last grid step.
                row = jax.lax.broadcasted_iota(jnp.int32, (tile_rows, _LANES), 0)
                lane = jax.lax.broadcasted_iota(jnp.int32, (tile_rows, _LANES), 1)
                # Row-granular compare avoids the *128 multiply (int32-safe
                # for any practical n).
                row_g = step * tile_rows + row
                if n_rem:
                    valid = (row_g < n_full_rows) | (
                        (row_g == n_full_rows) & (lane < n_rem))
                else:
                    valid = row_g < n_full_rows
                zero = jnp.float32(0.0)
                d = jnp.where(valid, d, zero)
                p = jnp.where(valid, p, zero)
                t = jnp.where(valid, t, zero)
                p_mn = jnp.where(valid, p_raw, jnp.inf)
                t_mn = jnp.where(valid, t_raw, jnp.inf)
                p_mx = jnp.where(valid, p_raw, -jnp.inf)
                t_mx = jnp.where(valid, t_raw, -jnp.inf)
            else:
                p_mn = p_mx = p_raw
                t_mn = t_mx = t_raw

            sse_acc[...] += _reduce(d * d, jnp.sum)
            sp_acc[...] += _reduce(p, jnp.sum)
            st_acc[...] += _reduce(t, jnp.sum)
            if need_corr:
                spp_acc[...] += _reduce(p * p, jnp.sum)
                stt_acc[...] += _reduce(t * t, jnp.sum)
                spt_acc[...] += _reduce(p * t, jnp.sum)
            minp_acc[...] = jnp.minimum(minp_acc[...], _reduce(p_mn, jnp.min))
            mint_acc[...] = jnp.minimum(mint_acc[...], _reduce(t_mn, jnp.min))
            maxp_acc[...] = jnp.maximum(maxp_acc[...], _reduce(p_mx, jnp.max))
            maxt_acc[...] = jnp.maximum(maxt_acc[...], _reduce(t_mx, jnp.max))

        # Mask work is confined to the last grid step.
        if needs_mask and grid > 1:
            @pl.when(step != last)
            def _steady():
                _accumulate(False)

            @pl.when(step == last)
            def _tail():
                _accumulate(True)
        elif needs_mask:
            _accumulate(True)
        else:
            _accumulate(False)

        @pl.when(step == last)
        def _finalize():
            # One XLU reduction pass + a single lane-dense (1,128) store.
            vals = [
                (0, jnp.sum(sse_acc[...], keepdims=True)),
                (1, jnp.sum(sp_acc[...], keepdims=True)),
                (2, jnp.sum(st_acc[...], keepdims=True)),
                (6, jnp.min(minp_acc[...], keepdims=True)),
                (7, jnp.min(mint_acc[...], keepdims=True)),
                (8, jnp.max(maxp_acc[...], keepdims=True)),
                (9, jnp.max(maxt_acc[...], keepdims=True)),
            ]
            if need_corr:
                vals += [
                    (3, jnp.sum(spp_acc[...], keepdims=True)),
                    (4, jnp.sum(stt_acc[...], keepdims=True)),
                    (5, jnp.sum(spt_acc[...], keepdims=True)),
                ]
            lane_id = jax.lax.broadcasted_iota(jnp.int32, (1, _LANES), 1)
            out = jnp.zeros((1, _LANES), jnp.float32)
            for idx, v in vals:
                out = jnp.where(lane_id == idx, v, out)
            out_ref[...] = out

    return kernel


def value_loss(pred, targ, existence_mask=None, *, force_pallas=False):
    """Mirrors ValueLoss.forward(pred, targ, existence_mask) -> (loss, info).

    existence_mask is accepted but unused, matching the reference forward pass.
    """
    pred = jnp.asarray(pred)
    targ = jnp.asarray(targ)
    B = pred.shape[0] if pred.ndim else 1
    need_corr = B > 1

    p_flat = pred.reshape(-1)
    t_flat = targ.reshape(-1)
    n = int(p_flat.shape[0])

    if n < _SMALL_N_FAST_PATH and not force_pallas:
        return _value_loss_jnp(pred, targ, need_corr)

    # Shift (first element) centers the one-pass moment sums used for corr.
    shift = jnp.stack([p_flat[0].astype(jnp.float32),
                       t_flat[0].astype(jnp.float32)])

    # Sublane-dense (rows, 128) layout in the NATIVE dtype (no host f32 cast).
    n_pad = _round_up(n, _SUBLANES * _LANES)
    if n_pad != n:
        # TODO(synk): this pad materializes a copy; only taken when n % 1024 != 0.
        p_flat = jnp.pad(p_flat, (0, n_pad - n))
        t_flat = jnp.pad(t_flat, (0, n_pad - n))
    rows = n_pad // _LANES
    p2 = p_flat.reshape(rows, _LANES)
    t2 = t_flat.reshape(rows, _LANES)

    tile_rows = min(_MAX_TILE_ROWS, rows)
    grid = pl.cdiv(rows, tile_rows)          # ragged last block masked in-kernel
    needs_mask = (grid * tile_rows * _LANES) != n

    kernel = _make_value_loss_kernel(n, tile_rows, grid, need_corr, needs_mask)
    n_acc = 10 if need_corr else 7

    stats = pl.pallas_call(
        kernel,
        out_shape=jax.ShapeDtypeStruct((1, _LANES), jnp.float32),
        grid_spec=pltpu.PrefetchScalarGridSpec(
            num_scalar_prefetch=1,
            grid=(grid,),
            in_specs=[pl.BlockSpec((tile_rows, _LANES), lambda i, s: (i, 0)),
                      pl.BlockSpec((tile_rows, _LANES), lambda i, s: (i, 0))],
            out_specs=pl.BlockSpec((1, _LANES), lambda i, s: (0, 0)),
            scratch_shapes=[pltpu.VMEM((_SUBLANES, _LANES), jnp.float32)
                            for _ in range(n_acc)],
        ),
        compiler_params=pltpu.CompilerParams(
            dimension_semantics=("arbitrary",),
            vmem_limit_bytes=32 * 1024 * 1024),
    )(shift, p2, t2)

    s = stats[0]
    nf = jnp.float32(n)
    shift_p, shift_t = shift[0], shift[1]

    loss = s[0] / nf                          # self._loss(pred, targ).mean()
    mean_pred = shift_p + s[1] / nf
    mean_targ = shift_t + s[2] / nf

    if need_corr:
        mp, mt = s[1] / nf, s[2] / nf         # shifted means
        cov = s[5] / nf - mp * mt
        var_p = s[3] / nf - mp * mp
        var_t = s[4] / nf - mt * mt
        corr = cov / jnp.sqrt(var_p * var_t)
    else:
        corr = jnp.float32(jnp.nan)

    info = {
        'mean_pred': mean_pred,
        'mean_targ': mean_targ,
        'min_pred': s[6],
        'min_targ': s[7],
        'max_pred': s[8],
        'max_targ': s[9],
        'corr': corr,
    }
    return loss, info


def _check(loss, info, ref_loss, ref_info, tol):
    assert abs(float(loss) - float(ref_loss)) < tol, "loss mismatch"
    for name in ('mean_pred', 'mean_targ', 'min_pred', 'min_targ',
                 'max_pred', 'max_targ', 'corr'):
        assert abs(float(info[name]) - float(ref_info[name])) < tol, name


if __name__ == "__main__":
    key = jax.random.PRNGKey(0)
    k1, k2, k3, k4 = jax.random.split(key, 4)

    # 1) Tiny shape matching the module's typical (B, 1) value predictions.
    B = 8
    pred = jax.random.normal(k1, (B, 1), dtype=jnp.float32)
    targ = jax.random.normal(k2, (B, 1), dtype=jnp.float32)
    existence_mask = jnp.ones((B, 1), dtype=jnp.float32)  # unused by forward

    loss, info = value_loss(pred, targ, existence_mask, force_pallas=True)
    jax.block_until_ready(loss)
    jax.block_until_ready(info)
    ref_loss, ref_info = _value_loss_jnp(pred, targ, need_corr=True)
    _check(loss, info, ref_loss, ref_info, 1e-4)

    # 2) Larger bf16 case exercising multi-step grid + ragged last block.
    pred2 = jax.random.normal(k3, (2600, 128), dtype=jnp.bfloat16)
    targ2 = jax.random.normal(k4, (2600, 128), dtype=jnp.bfloat16)
    loss2, info2 = value_loss(pred2, targ2, None, force_pallas=True)
    jax.block_until_ready(loss2)
    jax.block_until_ready(info2)
    ref_loss2, ref_info2 = _value_loss_jnp(pred2, targ2, need_corr=True)
    _check(loss2, info2, ref_loss2, ref_info2, 1e-3)

    print("KERNEL_OK")
</pallas_src>

<mosaic_0001>
module attributes {stable_mosaic.version = 11 : i64} {
  func.func @kernel(%arg0: i32, %arg1: memref<2xf32, #tpu.memory_space<smem>>, %arg2: memref<8x128xf32, #tpu.memory_space<vmem>>, %arg3: memref<8x128xf32, #tpu.memory_space<vmem>>, %arg4: memref<1x128xf32, #tpu.memory_space<vmem>>, %arg5: memref<8x128xf32, #tpu.memory_space<vmem>>, %arg6: memref<8x128xf32, #tpu.memory_space<vmem>>, %arg7: memref<8x128xf32, #tpu.memory_space<vmem>>, %arg8: memref<8x128xf32, #tpu.memory_space<vmem>>, %arg9: memref<8x128xf32, #tpu.memory_space<vmem>>, %arg10: memref<8x128xf32, #tpu.memory_space<vmem>>, %arg11: memref<8x128xf32, #tpu.memory_space<vmem>>, %arg12: memref<8x128xf32, #tpu.memory_space<vmem>>, %arg13: memref<8x128xf32, #tpu.memory_space<vmem>>, %arg14: memref<8x128xf32, #tpu.memory_space<vmem>>) attributes {dimension_semantics = [#tpu.dimension_semantics<arbitrary>], iteration_bounds = array<i64: 1>, scalar_prefetch = 1 : i64, scratch_operands = 10 : i64, tpu.core_type = #tpu.core_type<tc>, window_params = [{transform_indices = @transform_0, window_bounds = array<i64: 8, 128>}, {transform_indices = @transform_1, window_bounds = array<i64: 8, 128>}, {pipeline_mode = #tpu.pipeline_mode<synchronous>, transform_indices = @transform_2, window_bounds = array<i64: 1, 128>}]} {
    %c0_i32 = arith.constant 0 : i32
    %0 = arith.cmpi eq, %arg0, %c0_i32 : i32
    %1 = arith.extui %0 : i1 to i32
    %c0_i32_0 = arith.constant 0 : i32
    %2 = arith.cmpi ne, %1, %c0_i32_0 : i32
    scf.if %2 {
      %cst_56 = arith.constant 0.000000e+00 : f32
      %76 = vector.broadcast %cst_56 : f32 to vector<8x128xf32>
      %cst_57 = arith.constant 0x7F800000 : f32
      %77 = vector.broadcast %cst_57 : f32 to vector<8x128xf32>
      %c0_58 = arith.constant 0 : index
      %c0_59 = arith.constant 0 : index
      %78 = vector.load %arg5[%c0_58, %c0_59] : memref<8x128xf32, #tpu.memory_space<vmem>>, vector<8x128xf32>
      tpu.vector_store %arg5[%c0_58, %c0_59], %76 {strides = array<i32>} : memref<8x128xf32, #tpu.memory_space<vmem>>, vector<8x128xf32>,
      %c0_60 = arith.constant 0 : index
      %c0_61 = arith.constant 0 : index
      %79 = vector.load %arg6[%c0_60, %c0_61] : memref<8x128xf32, #tpu.memory_space<vmem>>, vector<8x128xf32>
      tpu.vector_store %arg6[%c0_60, %c0_61], %76 {strides = array<i32>} : memref<8x128xf32, #tpu.memory_space<vmem>>, vector<8x128xf32>,
      %c0_62 = arith.constant 0 : index
      %c0_63 = arith.constant 0 : index
      %80 = vector.load %arg7[%c0_62, %c0_63] : memref<8x128xf32, #tpu.memory_space<vmem>>, vector<8x128xf32>
      tpu.vector_store %arg7[%c0_62, %c0_63], %76 {strides = array<i32>} : memref<8x128xf32, #tpu.memory_space<vmem>>, vector<8x128xf32>,
      %c0_64 = arith.constant 0 : index
      %c0_65 = arith.constant 0 : index
      %81 = vector.load %arg8[%c0_64, %c0_65] : memref<8x128xf32, #tpu.memory_space<vmem>>, vector<8x128xf32>
      tpu.vector_store %arg8[%c0_64, %c0_65], %76 {strides = array<i32>} : memref<8x128xf32, #tpu.memory_space<vmem>>, vector<8x128xf32>,
      %c0_66 = arith.constant 0 : index
      %c0_67 = arith.constant 0 : index
      %82 = vector.load %arg9[%c0_66, %c0_67] : memref<8x128xf32, #tpu.memory_space<vmem>>, vector<8x128xf32>
      tpu.vector_store %arg9[%c0_66, %c0_67], %76 {strides = array<i32>} : memref<8x128xf32, #tpu.memory_space<vmem>>, vector<8x128xf32>,
      %c0_68 = arith.constant 0 : index
      %c0_69 = arith.constant 0 : index
      %83 = vector.load %arg10[%c0_68, %c0_69] : memref<8x128xf32, #tpu.memory_space<vmem>>, vector<8x128xf32>
      tpu.vector_store %arg10[%c0_68, %c0_69], %76 {strides = array<i32>} : memref<8x128xf32, #tpu.memory_space<vmem>>, vector<8x128xf32>,
      %c0_70 = arith.constant 0 : index
      %c0_71 = arith.constant 0 : index
      %84 = vector.load %arg11[%c0_70, %c0_71] : memref<8x128xf32, #tpu.memory_space<vmem>>, vector<8x128xf32>
      tpu.vector_store %arg11[%c0_70, %c0_71], %77 {strides = array<i32>} : memref<8x128xf32, #tpu.memory_space<vmem>>, vector<8x128xf32>,
      %c0_72 = arith.constant 0 : index
      %c0_73 = arith.constant 0 : index
      %85 = vector.load %arg12[%c0_72, %c0_73] : memref<8x128xf32, #tpu.memory_space<vmem>>, vector<8x128xf32>
      tpu.vector_store %arg12[%c0_72, %c0_73], %77 {strides = array<i32>} : memref<8x128xf32, #tpu.memory_space<vmem>>, vector<8x128xf32>,
      %cst_74 = arith.constant 0.000000e+00 : f32
      %86 = vector.broadcast %cst_74 : f32 to vector<8x128xf32>
      %87 = arith.subf %86, %77 : vector<8x128xf32>
      %c0_75 = arith.constant 0 : index
      %c0_76 = arith.constant 0 : index
      %88 = vector.load %arg13[%c0_75, %c0_76] : memref<8x128xf32, #tpu.memory_space<vmem>>, vector<8x128xf32>
      tpu.vector_store %arg13[%c0_75, %c0_76], %87 {strides = array<i32>} : memref<8x128xf32, #tpu.memory_space<vmem>>, vector<8x128xf32>,
      %cst_77 = arith.constant 0.000000e+00 : f32
      %89 = vector.broadcast %cst_77 : f32 to vector<8x128xf32>
      %90 = arith.subf %89, %77 : vector<8x128xf32>
      %c0_78 = arith.constant 0 : index
      %c0_79 = arith.constant 0 : index
      %91 = vector.load %arg14[%c0_78, %c0_79] : memref<8x128xf32, #tpu.memory_space<vmem>>, vector<8x128xf32>
      tpu.vector_store %arg14[%c0_78, %c0_79], %90 {strides = array<i32>} : memref<8x128xf32, #tpu.memory_space<vmem>>, vector<8x128xf32>,
    } else {
    }
    %c0 = arith.constant 0 : index
    %3 = memref.load %arg1[%c0] : memref<2xf32, #tpu.memory_space<smem>>
    %c1 = arith.constant 1 : index
    %4 = memref.load %arg1[%c1] : memref<2xf32, #tpu.memory_space<smem>>
    %c0_1 = arith.constant 0 : index
    %c0_2 = arith.constant 0 : index
    %5 = vector.load %arg2[%c0_1, %c0_2] : memref<8x128xf32, #tpu.memory_space<vmem>>, vector<8x128xf32>
    %c0_3 = arith.constant 0 : index
    %c0_4 = arith.constant 0 : index
    %6 = vector.load %arg3[%c0_3, %c0_4] : memref<8x128xf32, #tpu.memory_space<vmem>>, vector<8x128xf32>
    %7 = arith.subf %5, %6 : vector<8x128xf32>
    %8 = vector.broadcast %3 : f32 to vector<8x128xf32>
    %9 = arith.subf %5, %8 : vector<8x128xf32>
    %10 = vector.broadcast %4 : f32 to vector<8x128xf32>
    %11 = arith.subf %6, %10 : vector<8x128xf32>
    %12 = tpu.iota {dimensions = array<i32: 0>} : vector<8x128xi32>
    %13 = tpu.iota {dimensions = array<i32: 1>} : vector<8x128xi32>
    %c8_i32 = arith.constant 8 : i32
    %14 = arith.muli %arg0, %c8_i32 : i32
    %15 = vector.broadcast %14 : i32 to vector<8x128xi32>
    %16 = arith.addi %15, %12 : vector<8x128xi32>
    %c0_i32_5 = arith.constant 0 : i32
    %17 = vector.broadcast %c0_i32_5 : i32 to vector<8x128xi32>
    %18 = arith.cmpi slt, %16, %17 : vector<8x128xi32>
    %c0_i32_6 = arith.constant 0 : i32
    %19 = vector.broadcast %c0_i32_6 : i32 to vector<8x128xi32>
    %20 = arith.cmpi eq, %16, %19 : vector<8x128xi32>
    %c8_i32_7 = arith.constant 8 : i32
    %21 = vector.broadcast %c8_i32_7 : i32 to vector<8x128xi32>
    %22 = arith.cmpi slt, %13, %21 : vector<8x128xi32>
    %23 = arith.andi %20, %22 : vector<8x128xi1>
    %24 = arith.ori %18, %23 : vector<8x128xi1>
    %cst = arith.constant 0.000000e+00 : f32
    %25 = vector.broadcast %cst : f32 to vector<8x128xf32>
    %26 = arith.select %24, %7, %25 : vector<8x128xi1>, vector<8x128xf32>
    %cst_8 = arith.constant 0.000000e+00 : f32
    %27 = vector.broadcast %cst_8 : f32 to vector<8x128xf32>
    %28 = arith.select %24, %9, %27 : vector<8x128xi1>, vector<8x128xf32>
    %cst_9 = arith.constant 0.000000e+00 : f32
    %29 = vector.broadcast %cst_9 : f32 to vector<8x128xf32>
    %30 = arith.select %24, %11, %29 : vector<8x128xi1>, vector<8x128xf32>
    %cst_10 = arith.constant 0x7F800000 : f32
    %31 = vector.broadcast %cst_10 : f32 to vector<8x128xf32>
    %32 = arith.select %24, %5, %31 : vector<8x128xi1>, vector<8x128xf32>
    %cst_11 = arith.constant 0x7F800000 : f32
    %33 = vector.broadcast %cst_11 : f32 to vector<8x128xf32>
    %34 = arith.select %24, %6, %33 : vector<8x128xi1>, vector<8x128xf32>
    %cst_12 = arith.constant 0xFF800000 : f32
    %35 = vector.broadcast %cst_12 : f32 to vector<8x128xf32>
    %36 = arith.select %24, %5, %35 : vector<8x128xi1>, vector<8x128xf32>
    %cst_13 = arith.constant 0xFF800000 : f32
    %37 = vector.broadcast %cst_13 : f32 to vector<8x128xf32>
    %38 = arith.select %24, %6, %37 : vector<8x128xi1>, vector<8x128xf32>
    %c0_14 = arith.constant 0 : index
    %c0_15 = arith.constant 0 : index
    %39 = vector.load %arg5[%c0_14, %c0_15] : memref<8x128xf32, #tpu.memory_space<vmem>>, vector<8x128xf32>
    %40 = arith.mulf %26, %26 : vector<8x128xf32>
    %41 = arith.addf %39, %40 : vector<8x128xf32>
    %c0_16 = arith.constant 0 : index
    %c0_17 = arith.constant 0 : index
    %42 = vector.load %arg5[%c0_16, %c0_17] : memref<8x128xf32, #tpu.memory_space<vmem>>, vector<8x128xf32>
    tpu.vector_store %arg5[%c0_16, %c0_17], %41 {strides = array<i32>} : memref<8x128xf32, #tpu.memory_space<vmem>>, vector<8x128xf32>,
    %c0_18 = arith.constant 0 : index
    %c0_19 = arith.constant 0 : index
    %43 = vector.load %arg6[%c0_18, %c0_19] : memref<8x128xf32, #tpu.memory_space<vmem>>, vector<8x128xf32>
    %44 = arith.addf %43, %28 : vector<8x128xf32>
    %c0_20 = arith.constant 0 : index
    %c0_21 = arith.constant 0 : index
    %45 = vector.load %arg6[%c0_20, %c0_21] : memref<8x128xf32, #tpu.memory_space<vmem>>, vector<8x128xf32>
    tpu.vector_store %arg6[%c0_20, %c0_21], %44 {strides = array<i32>} : memref<8x128xf32, #tpu.memory_space<vmem>>, vector<8x128xf32>,
    %c0_22 = arith.constant 0 : index
    %c0_23 = arith.constant 0 : index
    %46 = vector.load %arg7[%c0_22, %c0_23] : memref<8x128xf32, #tpu.memory_space<vmem>>, vector<8x128xf32>
    %47 = arith.addf %46, %30 : vector<8x128xf32>
    %c0_24 = arith.constant 0 : index
    %c0_25 = arith.constant 0 : index
    %48 = vector.load %arg7[%c0_24, %c0_25] : memref<8x128xf32, #tpu.memory_space<vmem>>, vector<8x128xf32>
    tpu.vector_store %arg7[%c0_24, %c0_25], %47 {strides = array<i32>} : memref<8x128xf32, #tpu.memory_space<vmem>>, vector<8x128xf32>,
    %c0_26 = arith.constant 0 : index
    %c0_27 = arith.constant 0 : index
    %49 = vector.load %arg8[%c0_26, %c0_27] : memref<8x128xf32, #tpu.memory_space<vmem>>, vector<8x128xf32>
    %50 = arith.mulf %28, %28 : vector<8x128xf32>
    %51 = arith.addf %49, %50 : vector<8x128xf32>
    %c0_28 = arith.constant 0 : index
    %c0_29 = arith.constant 0 : index
    %52 = vector.load %arg8[%c0_28, %c0_29] : memref<8x128xf32, #tpu.memory_space<vmem>>, vector<8x128xf32>
    tpu.vector_store %arg8[%c0_28, %c0_29], %51 {strides = array<i32>} : memref<8x128xf32, #tpu.memory_space<vmem>>, vector<8x128xf32>,
    %c0_30 = arith.constant 0 : index
    %c0_31 = arith.constant 0 : index
    %53 = vector.load %arg9[%c0_30, %c0_31] : memref<8x128xf32, #tpu.memory_space<vmem>>, vector<8x128xf32>
    %54 = arith.mulf %30, %30 : vector<8x128xf32>
    %55 = arith.addf %53, %54 : vector<8x128xf32>
    %c0_32 = arith.constant 0 : index
    %c0_33 = arith.constant 0 : index
    %56 = vector.load %arg9[%c0_32, %c0_33] : memref<8x128xf32, #tpu.memory_space<vmem>>, vector<8x128xf32>
    tpu.vector_store %arg9[%c0_32, %c0_33], %55 {strides = array<i32>} : memref<8x128xf32, #tpu.memory_space<vmem>>, vector<8x128xf32>,
    %c0_34 = arith.constant 0 : index
    %c0_35 = arith.constant 0 : index
    %57 = vector.load %arg10[%c0_34, %c0_35] : memref<8x128xf32, #tpu.memory_space<vmem>>, vector<8x128xf32>
    %58 = arith.mulf %28, %30 : vector<8x128xf32>
    %59 = arith.addf %57, %58 : vector<8x128xf32>
    %c0_36 = arith.constant 0 : index
    %c0_37 = arith.constant 0 : index
    %60 = vector.load %arg10[%c0_36, %c0_37] : memref<8x128xf32, #tpu.memory_space<vmem>>, vector<8x128xf32>
    tpu.vector_store %arg10[%c0_36, %c0_37], %59 {strides = array<i32>} : memref<8x128xf32, #tpu.memory_space<vmem>>, vector<8x128xf32>,
    %c0_38 = arith.constant 0 : index
    %c0_39 = arith.constant 0 : index
    %61 = vector.load %arg11[%c0_38, %c0_39] : memref<8x128xf32, #tpu.memory_space<vmem>>, vector<8x128xf32>
    %62 = arith.minimumf %61, %32 : vector<8x128xf32>
    %c0_40 = arith.constant 0 : index
    %c0_41 = arith.constant 0 : index
    %63 = vector.load %arg11[%c0_40, %c0_41] : memref<8x128xf32, #tpu.memory_space<vmem>>, vector<8x128xf32>
    tpu.vector_store %arg11[%c0_40, %c0_41], %62 {strides = array<i32>} : memref<8x128xf32, #tpu.memory_space<vmem>>, vector<8x128xf32>,
    %c0_42 = arith.constant 0 : index
    %c0_43 = arith.constant 0 : index
    %64 = vector.load %arg12[%c0_42, %c0_43] : memref<8x128xf32, #tpu.memory_space<vmem>>, vector<8x128xf32>
    %65 = arith.minimumf %64, %34 : vector<8x128xf32>
    %c0_44 = arith.constant 0 : index
    %c0_45 = arith.constant 0 : index
    %66 = vector.load %arg12[%c0_44, %c0_45] : memref<8x128xf32, #tpu.memory_space<vmem>>, vector<8x128xf32>
    tpu.vector_store %arg12[%c0_44, %c0_45], %65 {strides = array<i32>} : memref<8x128xf32, #tpu.memory_space<vmem>>, vector<8x128xf32>,
    %c0_46 = arith.constant 0 : index
    %c0_47 = arith.constant 0 : index
    %67 = vector.load %arg13[%c0_46, %c0_47] : memref<8x128xf32, #tpu.memory_space<vmem>>, vector<8x128xf32>
    %68 = arith.maximumf %67, %36 : vector<8x128xf32>
    %c0_48 = arith.constant 0 : index
    %c0_49 = arith.constant 0 : index
    %69 = vector.load %arg13[%c0_48, %c0_49] : memref<8x128xf32, #tpu.memory_space<vmem>>, vector<8x128xf32>
    tpu.vector_store %arg13[%c0_48, %c0_49], %68 {strides = array<i32>} : memref<8x128xf32, #tpu.memory_space<vmem>>, vector<8x128xf32>,
    %c0_50 = arith.constant 0 : index
    %c0_51 = arith.constant 0 : index
    %70 = vector.load %arg14[%c0_50, %c0_51] : memref<8x128xf32, #tpu.memory_space<vmem>>, vector<8x128xf32>
    %71 = arith.maximumf %70, %38 : vector<8x128xf32>
    %c0_52 = arith.constant 0 : index
    %c0_53 = arith.constant 0 : index
    %72 = vector.load %arg14[%c0_52, %c0_53] : memref<8x128xf32, #tpu.memory_space<vmem>>, vector<8x128xf32>
    tpu.vector_store %arg14[%c0_52, %c0_53], %71 {strides = array<i32>} : memref<8x128xf32, #tpu.memory_space<vmem>>, vector<8x128xf32>,
    %c0_i32_54 = arith.constant 0 : i32
    %73 = arith.cmpi eq, %arg0, %c0_i32_54 : i32
    %74 = arith.extui %73 : i1 to i32
    %c0_i32_55 = arith.constant 0 : i32
    %75 = arith.cmpi ne, %74, %c0_i32_55 : i32
    scf.if %75 {
      %c0_56 = arith.constant 0 : index
      %c0_57 = arith.constant 0 : index
      %76 = vector.load %arg5[%c0_56, %c0_57] : memref<8x128xf32, #tpu.memory_space<vmem>>, vector<8x128xf32>
      %77 = vector.shape_cast %76 : vector<8x128xf32> to vector<1x8x128xf32>
      %cst_58 = arith.constant dense<0.000000e+00> : vector<1xf32>
      %78 = vector.multi_reduction <add>, %77, %cst_58 [1, 2] : vector<1x8x128xf32> to vector<1xf32>
      %79 = vector.shape_cast %78 : vector<1xf32> to vector<1x1x1xf32>
      %80 = vector.extract %79[0, 0, 0] : f32 from vector<1x1x1xf32>
      %81 = vector.broadcast %80 : f32 to vector<1x1xf32>
      %c0_59 = arith.constant 0 : index
      %c0_60 = arith.constant 0 : index
      %82 = vector.load %arg6[%c0_59, %c0_60] : memref<8x128xf32, #tpu.memory_space<vmem>>, vector<8x128xf32>
      %83 = vector.shape_cast %82 : vector<8x128xf32> to vector<1x8x128xf32>
      %cst_61 = arith.constant dense<0.000000e+00> : vector<1xf32>
      %84 = vector.multi_reduction <add>, %83, %cst_61 [1, 2] : vector<1x8x128xf32> to vector<1xf32>
      %85 = vector.shape_cast %84 : vector<1xf32> to vector<1x1x1xf32>
      %86 = vector.extract %85[0, 0, 0] : f32 from vector<1x1x1xf32>
      %87 = vector.broadcast %86 : f32 to vector<1x1xf32>
      %c0_62 = arith.constant 0 : index
      %c0_63 = arith.constant 0 : index
      %88 = vector.load %arg7[%c0_62, %c0_63] : memref<8x128xf32, #tpu.memory_space<vmem>>, vector<8x128xf32>
      %89 = vector.shape_cast %88 : vector<8x128xf32> to vector<1x8x128xf32>
      %cst_64 = arith.constant dense<0.000000e+00> : vector<1xf32>
      %90 = vector.multi_reduction <add>, %89, %cst_64 [1, 2] : vector<1x8x128xf32> to vector<1xf32>
      %91 = vector.shape_cast %90 : vector<1xf32> to vector<1x1x1xf32>
      %92 = vector.extract %91[0, 0, 0] : f32 from vector<1x1x1xf32>
      %93 = vector.broadcast %92 : f32 to vector<1x1xf32>
      %c0_65 = arith.constant 0 : index
      %c0_66 = arith.constant 0 : index
      %94 = vector.load %arg11[%c0_65, %c0_66] : memref<8x128xf32, #tpu.memory_space<vmem>>, vector<8x128xf32>
      %95 = vector.shape_cast %94 : vector<8x128xf32> to vector<1x8x128xf32>
      %cst_67 = arith.constant dense<0x7F800000> : vector<1xf32>
      %96 = vector.multi_reduction <minimumf>, %95, %cst_67 [1, 2] : vector<1x8x128xf32> to vector<1xf32>
      %97 = vector.shape_cast %96 : vector<1xf32> to vector<1x1x1xf32>
      %98 = vector.extract %97[0, 0, 0] : f32 from vector<1x1x1xf32>
      %99 = vector.broadcast %98 : f32 to vector<1x1xf32>
      %c0_68 = arith.constant 0 : index
      %c0_69 = arith.constant 0 : index
      %100 = vector.load %arg12[%c0_68, %c0_69] : memref<8x128xf32, #tpu.memory_space<vmem>>, vector<8x128xf32>
      %101 = vector.shape_cast %100 : vector<8x128xf32> to vector<1x8x128xf32>
      %cst_70 = arith.constant dense<0x7F800000> : vector<1xf32>
      %102 = vector.multi_reduction <minimumf>, %101, %cst_70 [1, 2] : vector<1x8x128xf32> to vector<1xf32>
      %103 = vector.shape_cast %102 : vector<1xf32> to vector<1x1x1xf32>
      %104 = vector.extract %103[0, 0, 0] : f32 from vector<1x1x1xf32>
      %105 = vector.broadcast %104 : f32 to vector<1x1xf32>
      %c0_71 = arith.constant 0 : index
      %c0_72 = arith.constant 0 : index
      %106 = vector.load %arg13[%c0_71, %c0_72] : memref<8x128xf32, #tpu.memory_space<vmem>>, vector<8x128xf32>
      %107 = vector.shape_cast %106 : vector<8x128xf32> to vector<1x8x128xf32>
      %cst_73 = arith.constant dense<0xFF800000> : vector<1xf32>
      %108 = vector.multi_reduction <maximumf>, %107, %cst_73 [1, 2] : vector<1x8x128xf32> to vector<1xf32>
      %109 = vector.shape_cast %108 : vector<1xf32> to vector<1x1x1xf32>
      %110 = vector.extract %109[0, 0, 0] : f32 from vector<1x1x1xf32>
      %111 = vector.broadcast %110 : f32 to vector<1x1xf32>
      %c0_74 = arith.constant 0 : index
      %c0_75 = arith.constant 0 : index
      %112 = vector.load %arg14[%c0_74, %c0_75] : memref<8x128xf32, #tpu.memory_space<vmem>>, vector<8x128xf32>
      %113 = vector.shape_cast %112 : vector<8x128xf32> to vector<1x8x128xf32>
      %cst_76 = arith.constant dense<0xFF800000> : vector<1xf32>
      %114 = vector.multi_reduction <maximumf>, %113, %cst_76 [1, 2] : vector<1x8x128xf32> to vector<1xf32>
      %115 = vector.shape_cast %114 : vector<1xf32> to vector<1x1x1xf32>
      %116 = vector.extract %115[0, 0, 0] : f32 from vector<1x1x1xf32>
      %117 = vector.broadcast %116 : f32 to vector<1x1xf32>
      %c0_77 = arith.constant 0 : index
      %c0_78 = arith.constant 0 : index
      %118 = vector.load %arg8[%c0_77, %c0_78] : memref<8x128xf32, #tpu.memory_space<vmem>>, vector<8x128xf32>
      %119 = vector.shape_cast %118 : vector<8x128xf32> to vector<1x8x128xf32>
      %cst_79 = arith.constant dense<0.000000e+00> : vector<1xf32>
      %120 = vector.multi_reduction <add>, %119, %cst_79 [1, 2] : vector<1x8x128xf32> to vector<1xf32>
      %121 = vector.shape_cast %120 : vector<1xf32> to vector<1x1x1xf32>
      %122 = vector.extract %121[0, 0, 0] : f32 from vector<1x1x1xf32>
      %123 = vector.broadcast %122 : f32 to vector<1x1xf32>
      %c0_80 = arith.constant 0 : index
      %c0_81 = arith.constant 0 : index
      %124 = vector.load %arg9[%c0_80, %c0_81] : memref<8x128xf32, #tpu.memory_space<vmem>>, vector<8x128xf32>
      %125 = vector.shape_cast %124 : vector<8x128xf32> to vector<1x8x128xf32>
      %cst_82 = arith.constant dense<0.000000e+00> : vector<1xf32>
      %126 = vector.multi_reduction <add>, %125, %cst_82 [1, 2] : vector<1x8x128xf32> to vector<1xf32>
      %127 = vector.shape_cast %126 : vector<1xf32> to vector<1x1x1xf32>
      %128 = vector.extract %127[0, 0, 0] : f32 from vector<1x1x1xf32>
      %129 = vector.broadcast %128 : f32 to vector<1x1xf32>
      %c0_83 = arith.constant 0 : index
      %c0_84 = arith.constant 0 : index
      %130 = vector.load %arg10[%c0_83, %c0_84] : memref<8x128xf32, #tpu.memory_space<vmem>>, vector<8x128xf32>
      %131 = vector.shape_cast %130 : vector<8x128xf32> to vector<1x8x128xf32>
      %cst_85 = arith.constant dense<0.000000e+00> : vector<1xf32>
      %132 = vector.multi_reduction <add>, %131, %cst_85 [1, 2] : vector<1x8x128xf32> to vector<1xf32>
      %133 = vector.shape_cast %132 : vector<1xf32> to vector<1x1x1xf32>
      %134 = vector.extract %133[0, 0, 0] : f32 from vector<1x1x1xf32>
      %135 = vector.broadcast %134 : f32 to vector<1x1xf32>
      %136 = tpu.iota {dimensions = array<i32: 1>} : vector<1x128xi32>
      %cst_86 = arith.constant 0.000000e+00 : f32
      %137 = vector.broadcast %cst_86 : f32 to vector<1x128xf32>
      %c0_i32_87 = arith.constant 0 : i32
      %138 = vector.broadcast %c0_i32_87 : i32 to vector<1x128xi32>
      %139 = arith.cmpi eq, %136, %138 : vector<1x128xi32>
      %140 = vector.shape_cast %81 : vector<1x1xf32> to vector<1x1xf32>
      %141 = vector.broadcast %140 : vector<1x1xf32> to vector<1x128xf32>
      %142 = arith.select %139, %141, %137 : vector<1x128xi1>, vector<1x128xf32>
      %c1_i32 = arith.constant 1 : i32
      %143 = vector.broadcast %c1_i32 : i32 to vector<1x128xi32>
      %144 = arith.cmpi eq, %136, %143 : vector<1x128xi32>
      %145 = vector.shape_cast %87 : vector<1x1xf32> to vector<1x1xf32>
      %146 = vector.broadcast %145 : vector<1x1xf32> to vector<1x128xf32>
      %147 = arith.select %144, %146, %142 : vector<1x128xi1>, vector<1x128xf32>
      %c2_i32 = arith.constant 2 : i32
      %148 = vector.broadcast %c2_i32 : i32 to vector<1x128xi32>
      %149 = arith.cmpi eq, %136, %148 : vector<1x128xi32>
      %150 = vector.shape_cast %93 : vector<1x1xf32> to vector<1x1xf32>
      %151 = vector.broadcast %150 : vector<1x1xf32> to vector<1x128xf32>
      %152 = arith.select %149, %151, %147 : vector<1x128xi1>, vector<1x128xf32>
      %c6_i32 = arith.constant 6 : i32
      %153 = vector.broadcast %c6_i32 : i32 to vector<1x128xi32>
      %154 = arith.cmpi eq, %136, %153 : vector<1x128xi32>
      %155 = vector.shape_cast %99 : vector<1x1xf32> to vector<1x1xf32>
      %156 = vector.broadcast %155 : vector<1x1xf32> to vector<1x128xf32>
      %157 = arith.select %154, %156, %152 : vector<1x128xi1>, vector<1x128xf32>
      %c7_i32 = arith.constant 7 : i32
      %158 = vector.broadcast %c7_i32 : i32 to vector<1x128xi32>
      %159 = arith.cmpi eq, %136, %158 : vector<1x128xi32>
      %160 = vector.shape_cast %105 : vector<1x1xf32> to vector<1x1xf32>
      %161 = vector.broadcast %160 : vector<1x1xf32> to vector<1x128xf32>
      %162 = arith.select %159, %161, %157 : vector<1x128xi1>, vector<1x128xf32>
      %c8_i32_88 = arith.constant 8 : i32
      %163 = vector.broadcast %c8_i32_88 : i32 to vector<1x128xi32>
      %164 = arith.cmpi eq, %136, %163 : vector<1x128xi32>
      %165 = vector.shape_cast %111 : vector<1x1xf32> to vector<1x1xf32>
      %166 = vector.broadcast %165 : vector<1x1xf32> to vector<1x128xf32>
      %167 = arith.select %164, %166, %162 : vector<1x128xi1>, vector<1x128xf32>
      %c9_i32 = arith.constant 9 : i32
      %168 = vector.broadcast %c9_i32 : i32 to vector<1x128xi32>
      %169 = arith.cmpi eq, %136, %168 : vector<1x128xi32>
      %170 = vector.shape_cast %117 : vector<1x1xf32> to vector<1x1xf32>
      %171 = vector.broadcast %170 : vector<1x1xf32> to vector<1x128xf32>
      %172 = arith.select %169, %171, %167 : vector<1x128xi1>, vector<1x128xf32>
      %c3_i32 = arith.constant 3 : i32
      %173 = vector.broadcast %c3_i32 : i32 to vector<1x128xi32>
      %174 = arith.cmpi eq, %136, %173 : vector<1x128xi32>
      %175 = vector.shape_cast %123 : vector<1x1xf32> to vector<1x1xf32>
      %176 = vector.broadcast %175 : vector<1x1xf32> to vector<1x128xf32>
      %177 = arith.select %174, %176, %172 : vector<1x128xi1>, vector<1x128xf32>
      %c4_i32 = arith.constant 4 : i32
      %178 = vector.broadcast %c4_i32 : i32 to vector<1x128xi32>
      %179 = arith.cmpi eq, %136, %178 : vector<1x128xi32>
      %180 = vector.shape_cast %129 : vector<1x1xf32> to vector<1x1xf32>
      %181 = vector.broadcast %180 : vector<1x1xf32> to vector<1x128xf32>
      %182 = arith.select %179, %181, %177 : vector<1x128xi1>, vector<1x128xf32>
      %c5_i32 = arith.constant 5 : i32
      %183 = vector.broadcast %c5_i32 : i32 to vector<1x128xi32>
      %184 = arith.cmpi eq, %136, %183 : vector<1x128xi32>
      %185 = vector.shape_cast %135 : vector<1x1xf32> to vector<1x1xf32>
      %186 = vector.broadcast %185 : vector<1x1xf32> to vector<1x128xf32>
      %187 = arith.select %184, %186, %182 : vector<1x128xi1>, vector<1x128xf32>
      %c0_89 = arith.constant 0 : index
      %c0_90 = arith.constant 0 : index
      %188 = vector.load %arg4[%c0_89, %c0_90] : memref<1x128xf32, #tpu.memory_space<vmem>>, vector<1x128xf32>
      tpu.vector_store %arg4[%c0_89, %c0_90], %187 {strides = array<i32>} : memref<1x128xf32, #tpu.memory_space<vmem>>, vector<1x128xf32>,
    } else {
    }
    return
  }
  func.func @transform_0(%arg0: i32, %arg1: memref<2xf32, #tpu.memory_space<smem>>) -> (i32, i32) {
    %c0_i32 = arith.constant 0 : i32
    %c0_i32_0 = arith.constant 0 : i32
    return %arg0, %c0_i32 : i32, i32
  }
  func.func @transform_1(%arg0: i32, %arg1: memref<2xf32, #tpu.memory_space<smem>>) -> (i32, i32) {
    %c0_i32 = arith.constant 0 : i32
    %c0_i32_0 = arith.constant 0 : i32
    return %arg0, %c0_i32 : i32, i32
  }
  func.func @transform_2(%arg0: i32, %arg1: memref<2xf32, #tpu.memory_space<smem>>) -> (i32, i32) {
    %c0_i32 = arith.constant 0 : i32
    %c0_i32_0 = arith.constant 0 : i32
    %c0_i32_1 = arith.constant 0 : i32
    return %c0_i32, %c0_i32_0 : i32, i32
  }
}

</mosaic_0001>

<bundles_post_ra>
// kernel: tpu_custom_call.1
= control target key start
LH: loop header
LB: loop body
LE: loop exit
PB: predicated region body
PF: predicated region fallthrough
CT: control target
= control target key end

     0   :  { %s479_s0 = inlined_call_operand.hbm [shape: f32[2], index: 0, kind: input, shape index: {}]   ;;  %s480_s1 = inlined_call_operand.hbm [shape: f32[8,128], index: 1, kind: input, shape index: {}]   ;;  %s481_s2 = inlined_call_operand.hbm [shape: f32[8,128], index: 2, kind: input, shape index: {}]   ;;  %s482_s3 = inlined_call_operand.hbm [shape: f32[1,128], index: 3, kind: output, shape index: {}]  }
   0x1   :  { %s292_s14 = scalar_lea.hbm %s479_s0, 16 }
   0x2   :  { %p293_p0 = scmp.ne.s32.totalorder %s479_s0, %s292_s14  ;;  %p296_p1 = scmp.lt.u32.totalorder %s292_s14, %s479_s0 }
   0x4   :  { %p298_p2 = pnand %p296_p1, %p293_p0 }
   0x6   :  { %301 = shalt.err (!%p298_p2)  }
   0x7   :  { %s376_s19 = smov [#allocation13]  }
   0x8   :  { %9 = dma.hbm_to_smem %s479_s0, 16, %s376_s19, [#allocation12] }
   0x9   :  { %368 = dma.done.wait [#allocation12], 16 }
   0xa   :  { %369 = vsyncadd [#allocation12], 4294967280 }
   0xb   :  { %11 = sfence }
   0xc   :  { %12 = vsyncpa [#allocation15], 0 }
   0xd   :  { %13 = vsyncpa [#allocation18], 0 }
   0xe   :  { %14 = vsyncpa [#allocation16], 0  ;;  %s377_s22 = smov [#allocation14]   ;;  %s378_s24 = smov [#allocation17]  }
   0xf   :  { %s21_s23 = sshll.u32 %s377_s22, 4  ;;  %s31_s25 = sshll.u32 %s378_s24, 4  ;;  %s22_s23 = int_to_ptr.vmem [resolvable:$true] %s21_s23  ;;  %s32_s25 = int_to_ptr.vmem [resolvable:$true] %s31_s25 }
  0x10   :  { %s302_s28 = scalar_lea.hbm %s480_s1, 128 }
  0x11   :  { %p303_p3 = scmp.ne.s32.totalorder %s480_s1, %s302_s28  ;;  %p306_p4 = scmp.lt.u32.totalorder %s302_s28, %s480_s1 }
  0x13   :  { %p308_p5 = pnand %p306_p4, %p303_p3 }
  0x15   :  { %311 = shalt.err (!%p308_p5)
}
  0x16   :  { %s312_s5 = scalar_lea.vmem %s22_s23, 128  ;;  %p317_p7 = scmp.lt.s32.totalorder %s22_s23, %s22_s23 }
  0x17   :  { %p313_p6 = scmp.ne.s32.totalorder %s22_s23, %s312_s5  ;;  %p318_p8 = scmp.lt.s32.totalorder %s312_s5, %s312_s5 }
  0x19   :  { %p319_p9 = por %p318_p8, %p317_p7 }
  0x1b   :  { %p320_p10 = pnand %p319_p9, %p313_p6 }
  0x1d   :  { %323 = shalt.err (!%p320_p10)
}
  0x1e   :  { %24 = dma.hbm_to_vmem [thread:$0]  %s480_s1, 128, %s22_s23, [#allocation15]  }
  0x1f   :  { %s324_s10 = scalar_lea.hbm %s481_s2, 128 }
  0x20   :  { %p325_p11 = scmp.ne.s32.totalorder %s481_s2, %s324_s10  ;;  %p328_p12 = scmp.lt.u32.totalorder %s324_s10, %s481_s2 }
  0x22   :  { %p330_p13 = pnand %p328_p12, %p325_p11 }
  0x24   :  { %333 = shalt.err (!%p330_p13)
}
  0x25   :  { %s334_s15 = scalar_lea.vmem %s32_s25, 128  ;;  %p339_p1 = scmp.lt.s32.totalorder %s32_s25, %s32_s25 }
  0x26   :  { %p335_p0 = scmp.ne.s32.totalorder %s32_s25, %s334_s15  ;;  %p340_p2 = scmp.lt.s32.totalorder %s334_s15, %s334_s15 }
  0x28   :  { %p341_p3 = por %p340_p2, %p339_p1 }
  0x2a   :  { %p342_p4 = pnand %p341_p3, %p335_p0 }
  0x2c   :  { %345 = shalt.err (!%p342_p4)
}
  0x2d   :  { %34 = dma.hbm_to_vmem [thread:$0]  %s481_s2, 128, %s32_s25, [#allocation18]  }
  0x2e   :  { %370 = dma.done.wait [#allocation15], 128  }
  0x2f   :  { %371 = vsyncadd [#allocation15], 4294967168 }
  0x30   :  { %372 = dma.done.wait [#allocation18], 128  }
  0x31   :  { %373 = vsyncadd [#allocation18], 4294967168  ;;  %v64_v0 = vlaneseq  ;;  %s55_s17 = sld [smem:[#allocation13]]  ;;  %s267_s18 = sld [smem:[#allocation13 + $0x1]]  ;;  %v58_v4 = vld [vmem:[#allocation17] sm:$0xff]  ;;  %v57_v5 = vld [vmem:[#allocation14] sm:$0xff] }
  0x32   :  { %v59_v11 = vsub.f32 %v57_v5, %v58_v4  ;;  %s379_s26 = smov [#allocation19]  }
  0x33   :  { %v65_v1 = vshrl.u32 %v64_v0, 7  ;;  %v436_v2 = vand.u32 127, %v64_v0  ;;  %s257_s27 = sshll.u32 %s379_s26, 4  ;;  %s258_s27 = int_to_ptr.vmem [resolvable:$true] %s257_s27 }
  0x34   :  { %s346_s30 = scalar_lea.vmem %s258_s27, 16  ;;  %s350_s0 = scalar_lea.vmem %s258_s27, 32 }
  0x35   :  { %vm72_vm0 = vcmp.eq.s32.totalorder %v65_v1, 0  ;;  %vm73_vm1 = vcmp.lt.s32.totalorder %v436_v2, 8  ;;  %vm220_vm3 = vcmp.eq.s32.totalorder %v436_v2, 0  ;;  %vm223_vm4 = vcmp.eq.s32.totalorder %v436_v2, 1  ;;  %p347_p5 = scmp.ne.s32.totalorder %s258_s27, %s346_s30  ;;  %p351_p6 = scmp.lt.s32.totalorder %s258_s27, %s258_s27 }
  0x36   :  { %vm439_vm2 = vmand %vm72_vm0, %vm73_vm1  ;;  %vm226_vm5 = vcmp.eq.s32.totalorder %v436_v2, 2  ;;  %vm229_vm6 = vcmp.eq.s32.totalorder %v436_v2, 6  ;;  %vm232_vm7 = vcmp.eq.s32.totalorder %v436_v2, 7  ;;  %vm235_vm8 = vcmp.eq.s32.totalorder %v436_v2, 8  ;;  %p352_p7 = scmp.lt.s32.totalorder %s350_s0, %s346_s30 }
  0x37   :  { %v60_v6 = vstv %s55_s17  ;;  %v62_v7 = vstv %s267_s18  ;;  %v80_v8 = vsel %vm439_vm2, %v58_v4, inf  ;;  %v79_v9 = vsel %vm439_vm2, %v57_v5, inf }
  0x38   :  { %v61_v10 = vsub.f32 %v57_v5, %v60_v6  ;;  %161 = vmin.xlane.f32.xlu0 %v80_v8  ;;  %151 = vmin.xlane.f32.xlu1 %v79_v9  ;;  %v81_v12 = vsel %vm439_vm2, %v57_v5, -inf  ;;  %v63_v14 = vsub.f32 %v58_v4, %v62_v7  ;;  %v76_v15 = vsel %vm439_vm2, %v59_v11, 0.0  ;;  %p353_p8 = por %p352_p7, %p351_p6 }
  0x39   :  { %v84_v16 = vmul.f32 %v76_v15, %v76_v15  ;;  %v82_v19 = vsel %vm439_vm2, %v58_v4, -inf  ;;  %vm238_vm9 = vcmp.eq.s32.totalorder %v436_v2, 9  ;;  %vm241_vm10 = vcmp.eq.s32.totalorder %v436_v2, 3 }
  0x3a   :  { %v77_v13 = vsel %vm439_vm2, %v61_v10, 0.0  ;;  %v78_v17 = vsel %vm439_vm2, %v63_v14, 0.0  ;;  %vm244_vm11 = vcmp.eq.s32.totalorder %v436_v2, 4  ;;  %vm247_vm12 = vcmp.eq.s32.totalorder %v436_v2, 5  ;;  %p354_p9 = pnand %p353_p8, %p347_p5 }
  0x3b   :  { %v94_v18 = vmul.f32 %v77_v13, %v77_v13  ;;  %v98_v20 = vmul.f32 %v78_v17, %v78_v17  ;;  %v102_v21 = vmul.f32 %v78_v17, %v77_v13 }
  0x3c   :  { %171 = vmax.xlane.f32.xlu1 %v81_v12  ;;  %131 = vadd.xlane.f32.xlu0 %v77_v13 }
  0x40   :  { %141 = vadd.xlane.f32.xlu1 %v78_v17  ;;  %121 = vadd.xlane.f32.xlu0 %v84_v16 }
  0x44   :  { %181 = vmax.xlane.f32.xlu0 %v82_v19  ;;  %191 = vadd.xlane.f32.xlu1 %v94_v18 }
  0x48   :  { %201 = vadd.xlane.f32.xlu0 %v98_v20  ;;  %211 = vadd.xlane.f32.xlu1 %v102_v21 }
  0xc5   :  { %v162_v22 = vpop.xlane.xlu0 %161  ;;  %v152_v23 = vpop.xlane.xlu1 %151 }
  0xc6   :  { %v163_v24 = vrot.slane %v162_v22, 4  ;;  %v153_v25 = vrot.slane %v152_v23, 4 }
  0xc8   :  { %v164_v30 = vmin.f32 %v162_v22, %v163_v24  ;;  %v154_v31 = vmin.f32 %v152_v23, %v153_v25 }
  0xc9   :  { %v172_v26 = vpop.xlane.xlu1 %171  ;;  %v132_v27 = vpop.xlane.xlu0 %131 }
  0xca   :  { %v173_v28 = vrot.slane %v172_v26, 4  ;;  %v133_v29 = vrot.slane %v132_v27, 4  ;;  %v165_v39 = vrot.slane %v164_v30, 2  ;;  %v155_v40 = vrot.slane %v154_v31, 2 }
  0xcc   :  { %v134_v32 = vadd.f32 %v133_v29, %v132_v27  ;;  %v174_v33 = vmax.f32 %v172_v26, %v173_v28  ;;  %v156_v51 = vmin.f32 %v154_v31, %v155_v40  ;;  %v166_v52 = vmin.f32 %v164_v30, %v165_v39 }
  0xcd   :  { %v142_v34 = vpop.xlane.xlu1 %141  ;;  %v122_v35 = vpop.xlane.xlu0 %121 }
  0xce   :  { %v135_v36 = vrot.slane %v134_v32, 2  ;;  %v143_v37 = vrot.slane %v142_v34, 4  ;;  %v123_v38 = vrot.slane %v122_v35, 4  ;;  %v175_v43 = vrot.slane %v174_v33, 2 }
  0xcf   :  { %v157_v4 = vrot.slane %v156_v51, 1  ;;  %v167_v5 = vrot.slane %v166_v52, 1 }
  0xd0   :  { %v144_v41 = vadd.f32 %v143_v37, %v142_v34  ;;  %v124_v42 = vadd.f32 %v123_v38, %v122_v35  ;;  %v136_v46 = vadd.f32 %v135_v36, %v134_v32  ;;  %v176_v60 = vmax.f32 %v174_v33, %v175_v43 }
  0xd1   :  { %v182_v44 = vpop.xlane.xlu0 %181  ;;  %v192_v45 = vpop.xlane.xlu1 %191  ;;  %v158_v20 = vmin.f32 %v156_v51, %v157_v4  ;;  %v168_v21 = vmin.f32 %v166_v52, %v167_v5 }
  0xd2   :  { %v145_v47 = vrot.slane %v144_v41, 2  ;;  %v125_v48 = vrot.slane %v124_v42, 2  ;;  %v183_v49 = vrot.slane %v182_v44, 4  ;;  %v193_v50 = vrot.slane %v192_v45, 4 }
  0xd3   :  { %v137_v59 = vrot.slane %v136_v46, 1  ;;  %v177_v13 = vrot.slane %v176_v60, 1 }
  0xd4   :  { %v184_v53 = vmax.f32 %v182_v44, %v183_v49  ;;  %v194_v54 = vadd.f32 %v193_v50, %v192_v45  ;;  %v126_v55 = vadd.f32 %v125_v48, %v124_v42  ;;  %v146_v56 = vadd.f32 %v145_v47, %v144_v41 }
  0xd5   :  { %v202_v57 = vpop.xlane.xlu0 %201  ;;  %v212_v58 = vpop.xlane.xlu1 %211  ;;  %v138_v11 = vadd.f32 %v137_v59, %v136_v46  ;;  %v178_v23 = vmax.f32 %v176_v60, %v177_v13 }
  0xd6   :  { %v185_v61 = vrot.slane %v184_v53, 2  ;;  %v195_v62 = vrot.slane %v194_v54, 2  ;;  %v203_v63 = vrot.slane %v202_v57, 4  ;;  %v213_v0 = vrot.slane %v212_v58, 4 }
  0xd7   :  { %v127_v1 = vrot.slane %v126_v55, 1  ;;  %v147_v3 = vrot.slane %v146_v56, 1 }
  0xd8   :  { %v204_v6 = vadd.f32 %v203_v63, %v202_v57  ;;  %v214_v7 = vadd.f32 %v213_v0, %v212_v58  ;;  %v186_v8 = vmax.f32 %v184_v53, %v185_v61  ;;  %v196_v9 = vadd.f32 %v195_v62, %v194_v54 }
  0xd9   :  { %v128_v10 = vadd.f32 %v127_v1, %v126_v55  ;;  %v148_v12 = vadd.f32 %v147_v3, %v146_v56 }
  0xda   :  { %v205_v14 = vrot.slane %v204_v6, 2  ;;  %v215_v15 = vrot.slane %v214_v7, 2  ;;  %v187_v16 = vrot.slane %v186_v8, 1  ;;  %v197_v17 = vrot.slane %v196_v9, 1 }
  0xdb   :  { %268 = vpush %v128_v10 }
  0xdc   :  { %v206_v18 = vadd.f32 %v205_v14, %v204_v6  ;;  %v216_v19 = vadd.f32 %v215_v15, %v214_v7  ;;  %270 = vpush %v138_v11  ;;  %v188_v22 = vmax.f32 %v186_v8, %v187_v16  ;;  %v198_v24 = vadd.f32 %v197_v17, %v196_v9 }
  0xdd   :  { %272 = vpush %v148_v12 }
  0xde   :  { %274 = vpush %v158_v20  ;;  %v207_v25 = vrot.slane %v206_v18, 1  ;;  %v217_v26 = vrot.slane %v216_v19, 1 }
  0xdf   :  { %276 = vpush %v168_v21 }
  0xe0   :  { %278 = vpush %v178_v23  ;;  %v208_v27 = vadd.f32 %v207_v25, %v206_v18  ;;  %v218_v28 = vadd.f32 %v217_v26, %v216_v19 }
  0xe1   :  { %280 = vpush %v188_v22 }
  0xe2   :  { %282 = vpush %v198_v24 }
  0xe3   :  { %284 = vpush %v208_v27 }
  0xe4   :  { %286 = vpush %v218_v28 }
 0x10c   :  { %s269_s2 = spop %268 }
 0x10d   :  { %v221_v29 = vstv %s269_s2  ;;  %s271_s19 = spop %270 }
 0x10e   :  { %v222_v30 = vsel %vm220_vm3, %v221_v29, 0.0  ;;  %v224_v31 = vstv %s271_s19  ;;  %s273_s20 = spop %272 }
 0x10f   :  { %v225_v32 = vsel %vm223_vm4, %v224_v31, %v222_v30  ;;  %v227_v33 = vstv %s273_s20  ;;  %s275_s21 = spop %274 }
 0x110   :  { %v228_v34 = vsel %vm226_vm5, %v227_v33, %v225_v32  ;;  %v230_v35 = vstv %s275_s21  ;;  %s277_s22 = spop %276 }
 0x111   :  { %v231_v36 = vsel %vm229_vm6, %v230_v35, %v228_v34  ;;  %v233_v37 = vstv %s277_s22  ;;  %s279_s23 = spop %278 }
 0x112   :  { %v234_v38 = vsel %vm232_vm7, %v233_v37, %v231_v36  ;;  %v236_v39 = vstv %s279_s23  ;;  %s281_s24 = spop %280 }
 0x113   :  { %v237_v40 = vsel %vm235_vm8, %v236_v39, %v234_v38  ;;  %v239_v41 = vstv %s281_s24  ;;  %s283_s25 = spop %282 }
 0x114   :  { %v240_v42 = vsel %vm238_vm9, %v239_v41, %v237_v40  ;;  %v242_v43 = vstv %s283_s25  ;;  %s285_s28 = spop %284 }
 0x115   :  { %v243_v44 = vsel %vm241_vm10, %v242_v43, %v240_v42  ;;  %v245_v45 = vstv %s285_s28  ;;  %s287_s29 = spop %286 }
 0x116   :  { %v246_v46 = vsel %vm244_vm11, %v245_v45, %v243_v44  ;;  %v248_v47 = vstv %s287_s29 }
 0x117   :  { %v249_v48 = vsel %vm247_vm12, %v248_v47, %v246_v46 }
 0x118   :  { %250 = vst [vmem:[#allocation19] sm:$0x1] %v249_v48 }
 0x119   :  { %357 = shalt.err (!%p354_p9)
}
 0x11a   :  { %s358_s6 = scalar_lea.hbm %s482_s3, 16 }
 0x11b   :  { %p359_p10 = scmp.ne.s32.totalorder %s482_s3, %s358_s6  ;;  %p362_p11 = scmp.lt.u32.totalorder %s358_s6, %s482_s3 }
 0x11d   :  { %p364_p12 = pnand %p362_p11, %p359_p10 }
 0x11f   :  { %367 = shalt.err (!%p364_p12)
}
 0x120   :  { %260 = dma.vmem_to_hbm [thread:$0]  %s258_s27, 16, %s482_s3, [#allocation16]  }
 0x121   :  { %374 = dma.done.wait [#allocation16], 16  }
 0x122   :  { %375 = vsyncadd [#allocation16], 4294967280 }
 0x123   :  { %264 = vsyncpa [#allocation15], 1 }
 0x124   :  { %265 = vsyncpa [#allocation18], 1 }
 0x125   :  { %266 = vsyncpa [#allocation16], 1 }

</bundles_post_ra>
